<compile_context>
chip_gen: v6e
topology: v6e:2x2x1
jax: 0.10.0
libtpu: 0.0.40
codegen_flags: <defaults>
</compile_context>

<pallas_src>
import functools

import numpy as np

import jax
import jax.numpy as jnp
from jax.experimental import pallas as pl
from jax.experimental.pallas import tpu as pltpu


# ---------------------------------------------------------------------------
# Pass 1: row-wise L2 normalization (F.normalize(z, dim=1), eps=1e-12) with
# sqrt(1/temperature) folded in, emitted in the compute dtype (bf16 default).
# ---------------------------------------------------------------------------
def _normalize_kernel(z_ref, zn_ref, *, scale):
    z = z_ref[...].astype(jnp.float32)
    ssq = jnp.sum(z * z, axis=1, keepdims=True)
    inv_norm = jax.lax.rsqrt(jnp.maximum(ssq, 1e-24)) * scale      # (TM, 1)
    zn_ref[...] = (z * inv_norm).astype(zn_ref.dtype)


# ---------------------------------------------------------------------------
# Pass 2: per-sample NT-Xent terms, tiled over (row tiles x column tiles).
# ---------------------------------------------------------------------------
def _ntxent_kernel(lab_row_ref, lab_col_ref, row_ref, part_ref, col_ref,
                   out_ref, neg_acc_ref, *,
                   batch_size, coarse_num, shift, tile_rows, tile_cols,
                   pos_from_diag):
    """One (row-tile, column-tile) chunk of the loss.

    lab_row_ref: (TM, 1) int32   labels of this row tile
    lab_col_ref: (1, TN) int32   labels of this column tile
    row_ref:     (TM, D)         normalized * sqrt(1/T) rows of this tile
    part_ref:    (TM, D)         partner rows (k + B) mod N (unused if
                                 pos_from_diag)
    col_ref:     (TN, D)         normalized * sqrt(1/T) rows of this col tile
    out_ref:     (TM, 1) f32     per-sample terms log(neg_den) - pos
    neg_acc_ref: (TM, 1) f32     running masked-exp sum (scratch)
    """
    i = pl.program_id(0)
    j = pl.program_id(1)
    last_j = pl.num_programs(1) - 1
    tm, tn, b = tile_rows, tile_cols, batch_size

    @pl.when(j == 0)
    def _():
        neg_acc_ref[...] = jnp.zeros_like(neg_acc_ref)

    row = row_ref[...]                                              # (TM, D)
    col = col_ref[...]                                              # (TN, D)

    # Similarity chunk on the MXU (bf16 x bf16 -> f32 accumulate). The
    # 1/temperature factor is already folded into the operands.
    sim = jax.lax.dot_general(
        row, col, dimension_numbers=(((1,), (1,)), ((), ())),
        preferred_element_type=jnp.float32)                         # (TM, TN)

    # --- rebuild the "non-negative" keep-mask from labels -----------------
    # For same-(valid)-class pairs the PyTorch mark_samples_discarded drops:
    #   * all off-diagonal TL entries (TL diagonal kept),
    #   * the full TR and BL blocks (incl. the positive-pair diagonals),
    #   * the BR upper triangle incl. its diagonal (BR strict lower kept).
    lab_r = lab_row_ref[...]                                        # (TM, 1)
    lab_c = lab_col_ref[...]                                        # (1, TN)
    row_valid = (lab_r >= 0) & (lab_r < coarse_num)                 # (TM, 1)
    same = (lab_r == lab_c) & row_valid                             # (TM, TN)

    r_idx = jax.lax.broadcasted_iota(jnp.int32, (tm, 1), 0) + i * tm
    c_idx = jax.lax.broadcasted_iota(jnp.int32, (1, tn), 1) + j * tn
    col_top = c_idx < b                                             # (1, TN)
    keep = (jnp.logical_not(same)
            | ((r_idx == c_idx) & col_top)                    # TL diag kept
            | ((r_idx > c_idx) & jnp.logical_not(col_top)))   # BR lower kept

    # exp shifted by the constant 1/T (max logit for unit-norm rows) so it
    # can never overflow in f32; the shift is added back after the log.
    neg_acc_ref[...] += jnp.sum(
        jnp.where(keep, jnp.exp(sim - shift), 0.0), axis=1, keepdims=True)

    @pl.when(j == last_j)
    def _():
        if pos_from_diag:
            # Fallback (single column chunk spanning all N columns): the
            # positive sim[k, (k+B) % N] lies on a shifted diagonal of `sim`.
            pos_mask = c_idx == ((r_idx + b) % (2 * b))
            pos = jnp.sum(jnp.where(pos_mask, sim, 0.0),
                          axis=1, keepdims=True)
        else:
            # Partner rows arrive pre-staged through the pipeline.
            part = part_ref[...].astype(jnp.float32)
            pos = jnp.sum(row.astype(jnp.float32) * part,
                          axis=1, keepdims=True)
        # -log(exp(pos) / neg_den) == log(neg_den) - pos
        out_ref[...] = jnp.log(neg_acc_ref[...]) + shift - pos


# ---------------------------------------------------------------------------
# Wrapper.
# ---------------------------------------------------------------------------
def _pick_row_tile(batch_size):
    # TM capped at 128: the MXU gains nothing above 128 rows and smaller
    # tiles keep vreg / VMEM pressure low on v5e.
    for t in (128, 64, 32, 16, 8):
        if batch_size % t == 0:
            return t
    return None


def _pick_col_tile(n_total):
    # Column chunk must be a multiple of 128 lanes (or the whole row).
    for t in (512, 256, 128):
        if n_total % t == 0:
            return t
    return n_total


def ntxent_loss_diff(z_i, z_j, labels_coarse, *, temperature, coarse_num,
                     compute_dtype=jnp.bfloat16):
    """Forward pass of NtXentLoss_diff (scalar loss)."""
    B, D = z_i.shape
    N = 2 * B

    tm = _pick_row_tile(B)
    if tm is None:
        # Batch not divisible by 8: single full tile, positives taken off the
        # (+B)-shifted diagonal of the similarity block.
        tm, tn, pos_from_diag = N, N, True
    else:
        tn = _pick_col_tile(N)
        pos_from_diag = False
    num_row_tiles = N // tm
    num_col_tiles = N // tn
    part_off = B // tm                 # row-tile offset of the partner block

    z = jnp.concatenate([z_i, z_j], axis=0).astype(jnp.float32)     # (N, D)
    # TODO(synk): pass 1 could be fused into the first column step of the
    # loss kernel (normalize into a persistent VMEM scratch); kept separate
    # since it is O(N*D) work vs the O(N^2*D) main pass.

    scale = float(np.sqrt(1.0 / temperature))
    zn = pl.pallas_call(
        functools.partial(_normalize_kernel, scale=scale),
        out_shape=jax.ShapeDtypeStruct((N, D), compute_dtype),
        grid=(num_row_tiles,),
        in_specs=[pl.BlockSpec((tm, D), lambda i: (i, 0))],
        out_specs=pl.BlockSpec((tm, D), lambda i: (i, 0)),
        compiler_params=pltpu.CompilerParams(dimension_semantics=("parallel",)),
    )(z)

    lab = jnp.asarray(labels_coarse, dtype=jnp.int32)
    lab2 = jnp.concatenate([lab, lab], axis=0)                      # (N,)
    lab_row = lab2.reshape(N, 1)
    lab_col = lab2.reshape(1, N)

    if pos_from_diag:
        part_spec = pl.BlockSpec((tm, D), lambda i, j: (0, 0))
    else:
        part_spec = pl.BlockSpec(
            (tm, D), lambda i, j: ((i + part_off) % num_row_tiles, 0))

    kernel = functools.partial(
        _ntxent_kernel,
        batch_size=B,
        coarse_num=int(coarse_num),
        shift=float(1.0 / temperature),
        tile_rows=tm,
        tile_cols=tn,
        pos_from_diag=pos_from_diag,
    )

    per_sample = pl.pallas_call(
        kernel,
        out_shape=jax.ShapeDtypeStruct((N, 1), jnp.float32),
        grid=(num_row_tiles, num_col_tiles),          # reduction axis last
        in_specs=[
            pl.BlockSpec((tm, 1), lambda i, j: (i, 0)),   # row-tile labels
            pl.BlockSpec((1, tn), lambda i, j: (0, j)),   # col-tile labels
            pl.BlockSpec((tm, D), lambda i, j: (i, 0)),   # row tile of zn
            part_spec,                                    # partner tile of zn
            pl.BlockSpec((tn, D), lambda i, j: (j, 0)),   # column tile of zn
        ],
        out_specs=pl.BlockSpec((tm, 1), lambda i, j: (i, 0)),
        scratch_shapes=[pltpu.VMEM((tm, 1), jnp.float32)],
        compiler_params=pltpu.CompilerParams(
            # TODO(synk): on v7x, CORE_PARALLEL on the row axis would split
            # work across the 2 TensorCores; kept portable here.
            dimension_semantics=("parallel", "arbitrary")),
    )(lab_row, lab_col, zn, zn, zn)

    # Tiny O(N) reduction; the (TM,1) output write is negligible HBM traffic.
    return jnp.sum(per_sample) / N


# ---------------------------------------------------------------------------
# Literal NumPy transcription of the PyTorch reference (self-check only).
# ---------------------------------------------------------------------------
def _reference_loss_np(z_i, z_j, labels, temperature, coarse_num):
    batch_size = z_i.shape[0]
    N = 2 * batch_size
    z = np.concatenate([z_i, z_j], axis=0).astype(np.float64)
    z = z / np.maximum(np.linalg.norm(z, axis=1, keepdims=True), 1e-12)
    sim = z @ z.T / temperature
    sim_i_j = np.diag(sim, k=batch_size)
    sim_j_i = np.diag(sim, k=-batch_size)
    labels = np.asarray(labels)
    mask = np.ones((N, N), dtype=bool)
    for i in range(coarse_num):
        class_index = np.flatnonzero(labels == i)      # ascending, 1-D
        for j in range(len(class_index)):
            index1 = int(class_index[j])
            for t in range(j, len(class_index)):
                index2 = int(class_index[t])
                if index1 != index2:
                    mask[index1, index2] = 0
                    mask[index2, index1] = 0
                mask[index1, index2 + batch_size] = 0
                mask[index2, index1 + batch_size] = 0
                mask[index1 + batch_size, index2] = 0
                mask[index1 + batch_size, index2 + batch_size] = 0
                mask[index2 + batch_size, index1] = 0
                mask[index2 + batch_size, index2 + batch_size] = 0
    positive = np.concatenate([sim_i_j, sim_j_i]).reshape(N, 1)
    neg_den = np.sum(np.exp(sim) * mask, axis=1, keepdims=True)
    return float((-np.log(np.exp(positive) / neg_den)).sum() / N)


if __name__ == "__main__":
    B, D = 128, 128
    coarse_num = 4
    temperature = 0.5

    key = jax.random.PRNGKey(0)
    k1, k2, k3 = jax.random.split(key, 3)
    z_i = jax.random.normal(k1, (B, D), dtype=jnp.float32)
    z_j = jax.random.normal(k2, (B, D), dtype=jnp.float32)
    labels_coarse = jax.random.randint(k3, (B,), 0, coarse_num, dtype=jnp.int32)

    ref = _reference_loss_np(np.asarray(z_i), np.asarray(z_j),
                             np.asarray(labels_coarse), temperature, coarse_num)

    # f32 compute path: tight tolerance — validates the mask semantics
    # (incl. the asymmetric bottom-right block) against the reference.
    loss_f32 = ntxent_loss_diff(z_i, z_j, labels_coarse,
                                temperature=temperature,
                                coarse_num=coarse_num,
                                compute_dtype=jnp.float32)
    loss_f32 = float(jax.block_until_ready(loss_f32))
    np.testing.assert_allclose(loss_f32, ref, rtol=1e-4, atol=1e-4)

    # bf16 compute path (production default): looser tolerance.
    loss_bf16 = ntxent_loss_diff(z_i, z_j, labels_coarse,
                                 temperature=temperature,
                                 coarse_num=coarse_num)
    loss_bf16 = float(jax.block_until_ready(loss_bf16))
    np.testing.assert_allclose(loss_bf16, ref, rtol=2e-2, atol=2e-2)

    print("KERNEL_OK")
</pallas_src>

<mosaic_0001>
module attributes {stable_mosaic.version = 11 : i64} {
  func.func @_normalize_kernel(%arg0: i32, %arg1: memref<128x128xf32, #tpu.memory_space<vmem>>, %arg2: memref<128x128xf32, #tpu.memory_space<vmem>>) attributes {dimension_semantics = [#tpu.dimension_semantics<parallel>], iteration_bounds = array<i64: 2>, scalar_prefetch = 0 : i64, scratch_operands = 0 : i64, tpu.core_type = #tpu.core_type<tc>, window_params = [{transform_indices = @transform_0, window_bounds = array<i64: 128, 128>}, {transform_indices = @transform_1, window_bounds = array<i64: 128, 128>}]} {
    %c0 = arith.constant 0 : index
    %c0_0 = arith.constant 0 : index
    %0 = vector.load %arg1[%c0, %c0_0] : memref<128x128xf32, #tpu.memory_space<vmem>>, vector<128x128xf32>
    %1 = arith.mulf %0, %0 : vector<128x128xf32>
    %cst = arith.constant dense<0.000000e+00> : vector<128xf32>
    %2 = vector.multi_reduction <add>, %1, %cst [1] : vector<128x128xf32> to vector<128xf32>
    %3 = vector.shape_cast %2 : vector<128xf32> to vector<128x1xf32>
    %cst_1 = arith.constant 1.000000e-24 : f32
    %4 = vector.broadcast %cst_1 : f32 to vector<128x1xf32>
    %5 = arith.maximumf %3, %4 : vector<128x1xf32>
    %6 = math.rsqrt %5 : vector<128x1xf32>
    %cst_2 = arith.constant 1.41421354 : f32
    %7 = vector.broadcast %cst_2 : f32 to vector<128x1xf32>
    %8 = arith.mulf %6, %7 : vector<128x1xf32>
    %9 = vector.broadcast %8 : vector<128x1xf32> to vector<128x128xf32>
    %10 = arith.mulf %0, %9 : vector<128x128xf32>
    %c0_3 = arith.constant 0 : index
    %c0_4 = arith.constant 0 : index
    %11 = vector.load %arg2[%c0_3, %c0_4] : memref<128x128xf32, #tpu.memory_space<vmem>>, vector<128x128xf32>
    tpu.vector_store %arg2[%c0_3, %c0_4], %10 {strides = array<i32>} : memref<128x128xf32, #tpu.memory_space<vmem>>, vector<128x128xf32>,
    return
  }
  func.func @transform_0(%arg0: i32) -> (i32, i32) {
    %c0_i32 = arith.constant 0 : i32
    %c0_i32_0 = arith.constant 0 : i32
    return %arg0, %c0_i32 : i32, i32
  }
  func.func @transform_1(%arg0: i32) -> (i32, i32) {
    %c0_i32 = arith.constant 0 : i32
    %c0_i32_0 = arith.constant 0 : i32
    return %arg0, %c0_i32 : i32, i32
  }
}

</mosaic_0001>

<bundles_post_ra>
// kernel: tpu_custom_call.1
= control target key start
LH: loop header
LB: loop body
LE: loop exit
PB: predicated region body
PF: predicated region fallthrough
CT: control target
= control target key end

     0   :  { %6 = vsyncpa [#allocation3], 0  ;;  %s851_s0 = inlined_call_operand.hbm [shape: f32[256,128], index: 0, kind: input, shape index: {}]   ;;  %s852_s1 = inlined_call_operand.hbm [shape: f32[256,128], index: 1, kind: output, shape index: {}]  }
   0x1   :  { %8 = vsyncpa [#allocation3 + $0x1], 0 }
   0x2   :  { %9 = vsyncpa [#allocation4], 0 }
   0x3   :  { %11 = vsyncpa [#allocation4 + $0x1], 0  ;;  %s576_s6 = smov 0   ;;  %s578_s7 = smov 0  }
   0x4   :  { %s580_s8 = smov 0   ;;  %s582_s9 = smov 0  }
   0x5 LB: > { %s597_s10 = sadd.s32 4294967295, %s558_s9   ;;  %s368_s11 = sadd.s32 4294967294, %s558_s9   ;;  %s558_s9 = sphi %s582_s9, %s867_s9   ;;  %s554_s8 = sphi %s580_s8, %s866_s8   ;;  %s550_s7 = sphi %s578_s7, %s865_s7   ;;  %s546_s6 = sphi %s576_s6, %s864_s6  }
   0x6   : > { %s601_s12 = sadd.s32 1, %s558_s9   ;;  %s24_s13 = sadd.s32 1, %s554_s8 }
   0x7   : > { %s21_s14 = ssub.s32 %s558_s9, %s601_s12  ;;  %p31_p0 = scmp.ne.s32.totalorder %s554_s8, %s550_s7 }
   0x8   : > { %p22_p1 = scmp.eq.s32.totalorder %s21_s14, 0  ;;  %p32_p2 = scmp.eq.s32.totalorder %s558_s9, 0 }
   0x9   : > { %p37_p3 = scmp.ne.s32.totalorder %s550_s7, %s546_s6  ;;  %p38_p4 = scmp.eq.s32.totalorder %s597_s10, 0 }
   0xa   : > { %s613_s15 = scalar_select %p22_p1, %s554_s8, %s24_s13  }
   0xb   : > { %p615_p5 = por %p32_p2, %p31_p0  ;;  %p619_p6 = por %p38_p4, %p37_p3 }
   0xc   : > { %p61_p7 = scmp.eq.s32.totalorder %s597_s10, 1  ;;  %p67_p8 = scmp.eq.s32.totalorder %s368_s11, 1 }
   0xd   : > { %s856_s17 = scalar_select %p619_p6, 1, 0 }
   0xe   : > { %p396_p10 = scmp.lt.s32.totalorder %s558_s9, 2  ;;  %p626_p11 = por %p61_p7, %p31_p0 }
   0xf   : > { %p630_p12 = por %p67_p8, %p37_p3  ;;  %s87_s20 = sand.u32 1, %s554_s8  }
  0x10   : > { %s857_s18 = scalar_select %p626_p11, 1, 0 }
  0x11   : > { %s858_s19 = scalar_select %p630_p12, 1, 0 }
  0x12   : > { %s382_s21 = sshll.u32 %s558_s9, 11  ;;  %s371_s22 = sshll.u32 %s87_s20, 7 }
  0x13   : > { %s639_s25 = scalar_lea.hbm %s851_s0, %s382_s21  ;;  %s91_s26 = scalar_lea.vmem [#allocation2], %s371_s22 }
  0x14   : > { %s98_s27 = sshll.u32 %s91_s26, 4  ;;  %p643_p13 = pnand %p396_p10, %p615_p5  ;;  %s647_s27 = int_to_ptr.vmem [resolvable:$true] %s98_s27 }
  0x15   : > { %s649_s29 = scalar_lea.sflag [#allocation3], %s87_s20  ;;  %s466_s30 = scalar_lea.hbm %s639_s25, 2048 }
  0x16   : > { %p467_p0 = scmp.ne.s32.totalorder %s639_s25, %s466_s30  ;;  %p468_p1 = pneg %p643_p13 }
  0x17   : > { %s471_s4 = scalar_lea.hbm %s851_s0, 4096  ;;  %p472_p4 = scmp.lt.s32.totalorder %s639_s25, %s851_s0 }
  0x18   : > { %p469_p2 = pnand %p468_p1, %p467_p0  ;;  %p473_p5 = scmp.lt.s32.totalorder %s471_s4, %s466_s30 }
  0x1a   : > { %p470_p3 = pneg %p469_p2  ;;  %p474_p7 = por %p473_p5, %p472_p4 }
  0x1c   : > { %p475_p8 = pnand %p474_p7, %p470_p3 }
  0x1e   : > { %478 = shalt.err (!%p475_p8)
}
  0x1f   : > { %s479_s13 = scalar_lea.vmem %s647_s27, 2048  ;;  %s560_s14 = smov [#allocation2]  }
  0x20   : > { %p480_p10 = scmp.ne.s32.totalorder %s647_s27, %s479_s13  ;;  %s484_s16 = sshll.u32 %s560_s14, 4  ;;  %s485_s16 = int_to_ptr.vmem [resolvable:$false] %s484_s16 }
  0x21   : > { %s486_s20 = scalar_lea.vmem %s485_s16, 4096  ;;  %p487_p2 = scmp.lt.s32.totalorder %s647_s27, %s485_s16 }
  0x22   : > { %p482_p9 = pnand %p480_p10, %p468_p1  ;;  %p488_p12 = scmp.lt.s32.totalorder %s486_s20, %s479_s13 }
  0x24   : > { %p483_p0 = pneg %p482_p9  ;;  %p489_p11 = por %p488_p12, %p487_p2 }
  0x26   : > { %p490_p6 = pnand %p489_p11, %p483_p0 }
  0x28   : > { %493 = shalt.err (!%p490_p6)
}
  0x29   : > { %s561_s21 = smov 128   ;;  %s562_s22 = smov 8  }
  0x2a   : > { %391 = dma.hbm_to_vmem [thread:$0]  (!%p643_p13), %s639_s25, 2048, %s647_s27, %s649_s29, %s561_s21, %s561_s21, %s562_s22  }
  0x2b   : > { %p374_p9 = scmp.ge.s32.totalorder %s558_s9, 1  ;;  %p106_p1 = scmp.lt.s32.totalorder %s558_s9, 3 }
  0x2d   : > { %p107_p3 = pnand %p374_p9, %p106_p1 }
  0x2e   : > { %s673_s23 = sand.u32 (!%p107_p3), 1, %s550_s7   ;;  %p860_p6 = scmp.ne.s32.totalorder (!%p107_p3), %s856_s17, 0 }
  0x2f   : > { %110 = sbr.rel (%p107_p3) target bundleno = 257 (0x101), region = 24  ;;  %s375_s24 = sshll.u32 (!%p107_p3), %s673_s23, 7 }
  0x30   : > { %s113_s26 = scalar_lea.sflag (!%p107_p3), [#allocation3], %s673_s23  ;;  %s679_s30 = scalar_lea.vmem (!%p107_p3), [#allocation2], %s375_s24 }
  0x34   : > { %537 = dma.done.wait (%p860_p6), %s113_s26, 2048  }
  0x35   : > { %539 = vsyncadd (%p860_p6), %s113_s26, 4294965248  ;;  %v686_v0 = vld [vmem:[%s679_s30 + $0x10] sm:$0xff]  ;;  %v689_v1 = vld [vmem:[%s679_s30] sm:$0xff]  ;;  %s769_s17 = scalar_lea.vmem [#allocation5], %s375_s24  ;;  %s383_s25 = sshll.u32 %s597_s10, 11 }
  0x36   : > { %v692_v2 = vld [vmem:[%s679_s30 + $0x18] sm:$0xff]  ;;  %v155_v3 = vmul.f32 %v686_v0, %v686_v0  ;;  %v153_v4 = vmul.f32 %v689_v1, %v689_v1  ;;  %v699_v5 = vld [vmem:[%s679_s30 + $0x8] sm:$0xff]  ;;  %v709_v9 = vld [vmem:[%s679_s30 + $0x20] sm:$0xff]  ;;  %s295_s27 = sshll.u32 %s769_s17, 4  ;;  %s803_s2 = scalar_lea.hbm %s852_s1, %s383_s25  ;;  %s805_s27 = int_to_ptr.vmem [resolvable:$true] %s295_s27 }
  0x37   : > { %v156_v6 = vmul.f32 %v692_v2, %v692_v2  ;;  %v154_v7 = vmul.f32 %v699_v5, %v699_v5  ;;  %v706_v8 = vld [vmem:[%s679_s30 + $0x28] sm:$0xff]  ;;  %v157_v11 = vmul.f32 %v709_v9, %v709_v9  ;;  %v716_v12 = vld [vmem:[%s679_s30 + $0x38] sm:$0xff]  ;;  %v719_v13 = vld [vmem:[%s679_s30 + $0x30] sm:$0xff]  ;;  %s282_s10 = scalar_lea.sflag [#allocation4], %s673_s23  ;;  %s494_s3 = scalar_lea.vmem %s805_s27, 2048 }
  0x38   : > { %173 = vadd.xlane.f32.xlu1 %v155_v3  ;;  %169 = vadd.xlane.f32.xlu0 %v153_v4  ;;  %v158_v10 = vmul.f32 %v706_v8, %v706_v8  ;;  %v160_v14 = vmul.f32 %v716_v12, %v716_v12  ;;  %v159_v15 = vmul.f32 %v719_v13, %v719_v13  ;;  %v726_v16 = vld [vmem:[%s679_s30 + $0x48] sm:$0xff]  ;;  %v729_v17 = vld [vmem:[%s679_s30 + $0x40] sm:$0xff]  ;;  %v736_v20 = vld [vmem:[%s679_s30 + $0x58] sm:$0xff]  ;;  %p495_p11 = scmp.ne.s32.totalorder %s805_s27, %s494_s3  ;;  %p861_p12 = scmp.ne.s32.totalorder %s857_s18, 0 }
  0x39   : > { %v162_v18 = vmul.f32 %v726_v16, %v726_v16  ;;  %v161_v19 = vmul.f32 %v729_v17, %v729_v17  ;;  %v739_v21 = vld [vmem:[%s679_s30 + $0x50] sm:$0xff]  ;;  %v164_v22 = vmul.f32 %v736_v20, %v736_v20  ;;  %v746_v24 = vld [vmem:[%s679_s30 + $0x68] sm:$0xff]  ;;  %v749_v25 = vld [vmem:[%s679_s30 + $0x60] sm:$0xff]  ;;  %s563_s4 = smov [#allocation5]  }
  0x3a   : > { %v163_v23 = vmul.f32 %v739_v21, %v739_v21  ;;  %v166_v26 = vmul.f32 %v746_v24, %v746_v24  ;;  %v165_v27 = vmul.f32 %v749_v25, %v749_v25  ;;  %v756_v28 = vld [vmem:[%s679_s30 + $0x78] sm:$0xff]  ;;  %v759_v29 = vld [vmem:[%s679_s30 + $0x70] sm:$0xff]  ;;  %p496_p13 = pnand %p495_p11, %p861_p12  ;;  %s498_s5 = sshll.u32 %s563_s4, 4  ;;  %s499_s5 = int_to_ptr.vmem [resolvable:$false] %s498_s5 }
  0x3b   : > { %v168_v30 = vmul.f32 %v756_v28, %v756_v28  ;;  %v167_v31 = vmul.f32 %v759_v29, %v759_v29  ;;  %s500_s11 = scalar_lea.vmem %s499_s5, 4096  ;;  %p501_p5 = scmp.lt.s32.totalorder %s805_s27, %s499_s5 }
  0x3c   : > { %175 = vadd.xlane.f32.xlu1 %v156_v6  ;;  %171 = vadd.xlane.f32.xlu0 %v154_v7  ;;  %p497_p4 = pneg %p496_p13  ;;  %p502_p7 = scmp.lt.s32.totalorder %s500_s11, %s494_s3 }
  0x3e   : > { %p503_p8 = por %p502_p7, %p501_p5 }
  0x40   : > { %179 = vadd.xlane.f32.xlu1 %v158_v10  ;;  %177 = vadd.xlane.f32.xlu0 %v157_v11  ;;  %p504_p10 = pnand %p503_p8, %p497_p4 }
  0x44   : > { %183 = vadd.xlane.f32.xlu1 %v160_v14  ;;  %181 = vadd.xlane.f32.xlu0 %v159_v15 }
  0x48   : > { %187 = vadd.xlane.f32.xlu1 %v162_v18  ;;  %185 = vadd.xlane.f32.xlu0 %v161_v19 }
  0x4c   : > { %191 = vadd.xlane.f32.xlu1 %v164_v22  ;;  %189 = vadd.xlane.f32.xlu0 %v163_v23 }
  0x50   : > { %195 = vadd.xlane.f32.xlu1 %v166_v26  ;;  %193 = vadd.xlane.f32.xlu0 %v165_v27 }
  0x54   : > { %199 = vadd.xlane.f32.xlu1 %v168_v30  ;;  %197 = vadd.xlane.f32.xlu0 %v167_v31 }
  0xc1   : > { %v174_v32 = vpop.xlane.xlu1 %173  ;;  %v170_v33 = vpop.xlane.xlu0 %169 }
  0xc2   : > { %v203_v34 = vmax.f32 %v174_v32, 1e-24  ;;  %v201_v35 = vmax.f32 %v170_v33, 1e-24 }
  0xc4   : > { %434 = vrsqrt.f32 %v203_v34 }
  0xc5   : > { %436 = vrsqrt.f32 %v201_v35  ;;  %v176_v36 = vpop.xlane.xlu1 %175  ;;  %v172_v37 = vpop.xlane.xlu0 %171 }
  0xc6   : > { %v204_v38 = vmax.f32 %v176_v36, 1e-24  ;;  %v202_v39 = vmax.f32 %v172_v37, 1e-24 }
  0xc8   : > { %438 = vrsqrt.f32 %v204_v38 }
  0xc9   : > { %440 = vrsqrt.f32 %v202_v39  ;;  %v180_v40 = vpop.xlane.xlu1 %179  ;;  %v178_v41 = vpop.xlane.xlu0 %177 }
  0xca   : > { %v206_v42 = vmax.f32 %v180_v40, 1e-24  ;;  %v205_v43 = vmax.f32 %v178_v41, 1e-24 }
  0xcc   : > { %442 = vrsqrt.f32 %v206_v42 }
  0xcd   : > { %444 = vrsqrt.f32 %v205_v43  ;;  %v184_v44 = vpop.xlane.xlu1 %183  ;;  %v182_v45 = vpop.xlane.xlu0 %181 }
  0xce   : > { %v208_v46 = vmax.f32 %v184_v44, 1e-24  ;;  %v207_v47 = vmax.f32 %v182_v45, 1e-24 }
  0xd0   : > { %446 = vrsqrt.f32 %v208_v46 }
  0xd1   : > { %v435_v48 = vpop.eup %434  ;;  %448 = vrsqrt.f32 %v207_v47  ;;  %v188_v49 = vpop.xlane.xlu1 %187 }
  0xd2   : > { %v186_v50 = vpop.xlane.xlu0 %185  ;;  %v437_v51 = vpop.eup %436  ;;  %v235_v52 = vmul.f32 1.4142135, %v435_v48  ;;  %v210_v53 = vmax.f32 %v188_v49, 1e-24 }
  0xd3   : > { %v209_v54 = vmax.f32 %v186_v50, 1e-24  ;;  %v233_v55 = vmul.f32 1.4142135, %v437_v51 }
  0xd4   : > { %v251_v56 = vmul.f32 %v235_v52, %v686_v0  ;;  %450 = vrsqrt.f32 %v210_v53 }
  0xd5   : > { %v439_v57 = vpop.eup %438  ;;  %v249_v58 = vmul.f32 %v233_v55, %v689_v1  ;;  %452 = vrsqrt.f32 %v209_v54  ;;  %v192_v59 = vpop.xlane.xlu1 %191 }
  0xd6   : > { %v190_v60 = vpop.xlane.xlu0 %189  ;;  %v441_v61 = vpop.eup %440  ;;  %267 = vst [vmem:[%s769_s17 + $0x10] sm:$0xff] %v251_v56  ;;  %v236_v62 = vmul.f32 1.4142135, %v439_v57  ;;  %v212_v63 = vmax.f32 %v192_v59, 1e-24 }
  0xd7   : > { %v211_v3 = vmax.f32 %v190_v60, 1e-24  ;;  %265 = vst [vmem:[%s769_s17] sm:$0xff] %v249_v58  ;;  %v234_v0 = vmul.f32 1.4142135, %v441_v61 }
  0xd8   : > { %v252_v4 = vmul.f32 %v236_v62, %v692_v2  ;;  %454 = vrsqrt.f32 %v212_v63 }
  0xd9   : > { %v443_v1 = vpop.eup %442  ;;  %v250_v6 = vmul.f32 %v234_v0, %v699_v5  ;;  %456 = vrsqrt.f32 %v211_v3  ;;  %v196_v7 = vpop.xlane.xlu1 %195 }
  0xda   : > { %v194_v10 = vpop.xlane.xlu0 %193  ;;  %v445_v11 = vpop.eup %444  ;;  %268 = vst [vmem:[%s769_s17 + $0x18] sm:$0xff] %v252_v4  ;;  %v238_v14 = vmul.f32 1.4142135, %v443_v1  ;;  %v214_v15 = vmax.f32 %v196_v7, 1e-24 }
  0xdb   : > { %v213_v18 = vmax.f32 %v194_v10, 1e-24  ;;  %266 = vst [vmem:[%s769_s17 + $0x8] sm:$0xff] %v250_v6  ;;  %v237_v19 = vmul.f32 1.4142135, %v445_v11 }
  0xdc   : > { %v254_v22 = vmul.f32 %v238_v14, %v706_v8  ;;  %458 = vrsqrt.f32 %v214_v15 }
  0xdd   : > { %v447_v2 = vpop.eup %446  ;;  %v253_v23 = vmul.f32 %v237_v19, %v709_v9  ;;  %460 = vrsqrt.f32 %v213_v18  ;;  %v200_v5 = vpop.xlane.xlu1 %199 }
  0xde   : > { %v198_v26 = vpop.xlane.xlu0 %197  ;;  %v449_v27 = vpop.eup %448  ;;  %270 = vst [vmem:[%s769_s17 + $0x28] sm:$0xff] %v254_v22  ;;  %v240_v30 = vmul.f32 1.4142135, %v447_v2  ;;  %v216_v31 = vmax.f32 %v200_v5, 1e-24 }
  0xdf   : > { %v215_v32 = vmax.f32 %v198_v26, 1e-24  ;;  %269 = vst [vmem:[%s769_s17 + $0x20] sm:$0xff] %v253_v23  ;;  %v239_v33 = vmul.f32 1.4142135, %v449_v27 }
  0xe0   : > { %v256_v34 = vmul.f32 %v240_v30, %v716_v12  ;;  %462 = vrsqrt.f32 %v216_v31 }
  0xe1   : > { %v451_v8 = vpop.eup %450  ;;  %v255_v9 = vmul.f32 %v239_v33, %v719_v13  ;;  %464 = vrsqrt.f32 %v215_v32 }
  0xe2   : > { %v453_v35 = vpop.eup %452  ;;  %272 = vst [vmem:[%s769_s17 + $0x38] sm:$0xff] %v256_v34  ;;  %v242_v36 = vmul.f32 1.4142135, %v451_v8 }
  0xe3   : > { %271 = vst [vmem:[%s769_s17 + $0x30] sm:$0xff] %v255_v9  ;;  %v241_v37 = vmul.f32 1.4142135, %v453_v35 }
  0xe4   : > { %v258_v38 = vmul.f32 %v242_v36, %v726_v16 }
  0xe5   : > { %v455_v39 = vpop.eup %454  ;;  %v257_v40 = vmul.f32 %v241_v37, %v729_v17 }
  0xe6   : > { %v457_v41 = vpop.eup %456  ;;  %274 = vst [vmem:[%s769_s17 + $0x48] sm:$0xff] %v258_v38  ;;  %v244_v12 = vmul.f32 1.4142135, %v455_v39 }
  0xe7   : > { %273 = vst [vmem:[%s769_s17 + $0x40] sm:$0xff] %v257_v40  ;;  %v243_v13 = vmul.f32 1.4142135, %v457_v41 }
  0xe8   : > { %v260_v42 = vmul.f32 %v244_v12, %v736_v20 }
  0xe9   : > { %v459_v43 = vpop.eup %458  ;;  %v259_v44 = vmul.f32 %v243_v13, %v739_v21 }
  0xea   : > { %v461_v45 = vpop.eup %460  ;;  %276 = vst [vmem:[%s769_s17 + $0x58] sm:$0xff] %v260_v42  ;;  %v246_v16 = vmul.f32 1.4142135, %v459_v43 }
  0xeb   : > { %275 = vst [vmem:[%s769_s17 + $0x50] sm:$0xff] %v259_v44  ;;  %v245_v17 = vmul.f32 1.4142135, %v461_v45 }
  0xec   : > { %v262_v46 = vmul.f32 %v246_v16, %v746_v24 }
  0xed   : > { %v463_v47 = vpop.eup %462  ;;  %v261_v48 = vmul.f32 %v245_v17, %v749_v25 }
  0xee   : > { %v465_v20 = vpop.eup %464  ;;  %278 = vst [vmem:[%s769_s17 + $0x68] sm:$0xff] %v262_v46  ;;  %v248_v49 = vmul.f32 1.4142135, %v463_v47 }
  0xef   : > { %277 = vst [vmem:[%s769_s17 + $0x60] sm:$0xff] %v261_v48  ;;  %v247_v21 = vmul.f32 1.4142135, %v465_v20 }
  0xf0   : > { %v264_v50 = vmul.f32 %v248_v49, %v756_v28 }
  0xf1   : > { %v263_v24 = vmul.f32 %v247_v21, %v759_v29 }
  0xf2   : > { %280 = vst [vmem:[%s769_s17 + $0x78] sm:$0xff] %v264_v50 }
  0xf3   : > { %279 = vst [vmem:[%s769_s17 + $0x70] sm:$0xff] %v263_v24 }
  0xf4   : > { %507 = shalt.err (!%p504_p10)
}
  0xf5   : > { %s508_s13 = scalar_lea.hbm %s803_s2, 2048  ;;  %s512_s20 = scalar_lea.hbm %s852_s1, 4096 }
  0xf6   : > { %p509_p0 = scmp.ne.s32.totalorder %s803_s2, %s508_s13  ;;  %p513_p1 = scmp.lt.s32.totalorder %s803_s2, %s852_s1 }
  0xf7   : > { %p514_p3 = scmp.lt.s32.totalorder %s512_s20, %s508_s13 }
  0xf8   : > { %p510_p2 = pnand %p509_p0, %p861_p12 }
  0xf9   : > { %p515_p6 = por %p514_p3, %p513_p1 }
  0xfa   : > { %p511_p9 = pneg %p510_p2 }
  0xfc   : > { %p516_p11 = pnand %p515_p6, %p511_p9 }
  0xfe   : > { %519 = shalt.err (!%p516_p11)
}
  0xff   : > { %s564_s24 = smov 128   ;;  %s565_s26 = smov 8  }
 0x100   : > { %386 = dma.vmem_to_hbm [thread:$0]  (%p861_p12), %s805_s27, 2048, %s803_s2, %s282_s10, %s564_s24, %s564_s24, %s565_s26  }
 0x101 PF: > { %s310_s30 = sand.u32 1, %s546_s6   ;;  %p862_p13 = scmp.ne.s32.totalorder %s858_s19, 0 }
 0x102   : > { %p863_p4 = scmp.ge.s32.totalorder %s558_s9, 2  ;;  %s311_s17 = scalar_lea.sflag [#allocation4], %s310_s30 }
 0x104   : > { %p393_p5 = pnand %p863_p4, %p862_p13 }
 0x106   : > { %p394_p7 = pneg %p393_p5 }
 0x108   : > { %541 = dma.done.wait (%p394_p7), %s311_s17, 2048  }
 0x109   : > { %543 = vsyncadd (%p394_p7), %s311_s17, 4294965248  ;;  %p14_p8 = scmp.ge.s32.totalorder %s601_s12, 4   ;;  %s864_s6 = smov %s550_s7 }
 0x10a   : > { %s865_s7 = smov %s554_s8  ;;  %s866_s8 = smov %s613_s15 }
 0x10b   : > { %s867_s9 = smov %s601_s12  ;;  %16 = sbr.rel (!%p14_p8) target bundleno = 5 (0x5), region = 69 }
 0x110   :  { %316 = vsyncpa [#allocation3], 1 }
 0x111   :  { %318 = vsyncpa [#allocation3 + $0x1], 1 }
 0x112   :  { %319 = vsyncpa [#allocation4], 1 }
 0x113   :  { %321 = vsyncpa [#allocation4 + $0x1], 1 }

</bundles_post_ra>
